<compile_context>
chip_gen: v7x
topology: tpu7x:2x2x1
jax: 0.10.0
libtpu: 0.0.40
codegen_flags: <defaults>
</compile_context>

<pallas_src>
import functools

import jax
import jax.numpy as jnp
from jax import lax
from jax.experimental import pallas as pl
from jax.experimental.pallas import tpu as pltpu


NEG_SLOPE = 0.01    # nn.LeakyReLU default negative_slope
BN_EPS = 1e-5       # nn.BatchNorm1d default eps
LANE = 128          # TPU lane width; batch tiles are multiples of this
TB_MAX = 8192       # max batch-tile lanes (f32: ~0.5 MiB in + ~0.25 MiB out, double-buffered)
SPLIT_MIN = 2048    # single-tile batches at least this big get split into 2 tiles (v7x megacore)


def _leaky_relu(x):
    return jnp.where(x >= 0, x, NEG_SLOPE * x)


def _cdiv(a, b):
    return -(-a // b)


def _round_up(x, m):
    return _cdiv(x, m) * m


def vae_decoder_kernel(zT_ref, w1_ref, w2_ref, b2_ref, w3_ref, b3_ref, out_ref,
                       *, apply_sigmoid: bool):
    # fc[0]: Linear(zc_dim, 16, bias=False); fc[1]: Dropout -> identity (eval); fc[2]: LeakyReLU
    h = jnp.dot(w1_ref[...], zT_ref[...], preferred_element_type=jnp.float32)      # (16, TB)
    h = _leaky_relu(h)
    # fc[3]: BatchNorm1d(16) folded into fc[4]: Linear(16, 8); fc[5]: Dropout; fc[6]: LeakyReLU
    h = jnp.dot(w2_ref[...], h, preferred_element_type=jnp.float32) + b2_ref[...]  # (8, TB)
    h = _leaky_relu(h)
    # fc[7]: BatchNorm1d(8) folded into fc[8]: Linear(8, out_dim)
    y = jnp.dot(w3_ref[...], h, preferred_element_type=jnp.float32) + b3_ref[...]  # (out_dim, TB)
    if apply_sigmoid:  # target == 'D'
        # exp lands on the EUP slot; exact divide kept for precision (kernel is not VALU-bound).
        y = 1.0 / (1.0 + jnp.exp(-y))
    out_ref[...] = y.astype(out_ref.dtype)   # lane-dense store: last dim = TB (multiple of 128)


def _fold_bn_params(p):
    """Fold eval-mode BatchNorm1d into the following Linear; return transposed (out,in) mats."""
    s1 = p["bn1_gamma"] * lax.rsqrt(p["bn1_var"] + BN_EPS)     # (1, 16)
    t1 = p["bn1_beta"] - p["bn1_mean"] * s1                    # (1, 16)
    w2fT = p["w2"].T * s1                                      # (8, 16)
    b2fT = p["w2"].T @ t1.T + p["b2"].T                        # (8, 1)

    s2 = p["bn2_gamma"] * lax.rsqrt(p["bn2_var"] + BN_EPS)     # (1, 8)
    t2 = p["bn2_beta"] - p["bn2_mean"] * s2                    # (1, 8)
    w3fT = p["w3"].T * s2                                      # (out_dim, 8)
    b3fT = p["w3"].T @ t2.T + p["b3"].T                        # (out_dim, 1)
    return p["w1"].T, w2fT, b2fT, w3fT, b3fT


def vae_decoder_forward(z, params, target):
    """Fused VAEDecoder forward pass (eval mode).

    z: (B, zc_dim) float32, params: dict (see init_params), target: 'D' applies sigmoid.
    """
    b, zc_dim = z.shape
    out_dim = params["w3"].shape[1]
    w1T, w2fT, b2fT, w3fT, b3fT = _fold_bn_params(params)

    # Feature-major layout: batch on the 128-lane axis; cheap XLA transposes on tiny tensors.
    zT = z.T                                      # (zc_dim, B)
    bp = _round_up(b, LANE)
    n_tiles = _cdiv(bp, TB_MAX)
    if n_tiles == 1 and bp >= SPLIT_MIN:
        n_tiles = 2                               # give v7x megacore two tiles to shard
    if n_tiles > 1 and n_tiles % 2:
        n_tiles += 1                              # even grid length -> balanced TC sharding
    tb = _round_up(_cdiv(bp, n_tiles), LANE)
    bp = n_tiles * tb
    if bp != b:
        zT = jnp.pad(zT, ((0, 0), (0, bp - b)))   # zero-padded columns, sliced off afterwards

    const = lambda i: (0, 0)                      # params stay resident in VMEM across grid steps
    kernel = functools.partial(vae_decoder_kernel, apply_sigmoid=(target == "D"))

    outT = pl.pallas_call(
        kernel,
        out_shape=jax.ShapeDtypeStruct((out_dim, bp), jnp.float32),
        grid_spec=pltpu.PrefetchScalarGridSpec(
            num_scalar_prefetch=0,
            grid=(n_tiles,),
            in_specs=[
                pl.BlockSpec((zc_dim, tb), lambda i: (0, i)),   # streamed, lane-dense batch tile
                pl.BlockSpec(w1T.shape, const),
                pl.BlockSpec(w2fT.shape, const),
                pl.BlockSpec(b2fT.shape, const),
                pl.BlockSpec(w3fT.shape, const),
                pl.BlockSpec(b3fT.shape, const),
            ],
            out_specs=pl.BlockSpec((out_dim, tb), lambda i: (0, i)),  # lane-dense output tile
        ),
        compiler_params=pltpu.CompilerParams(
            dimension_semantics=("parallel",),    # shard batch tiles across TCs (v7x megacore)
        ),
    )(zT, w1T, w2fT, b2fT, w3fT, b3fT)

    out = outT.T                                  # (bp, out_dim)
    return out[:b] if bp != b else out


def init_params(key, zc_dim, out_dim):
    """Deterministic parameter init matching the shapes in VAEDecoder.__init__."""
    k1, k2, k3, k4, k5 = jax.random.split(key, 5)

    def unif(k, shape, fan_in):
        bound = 1.0 / jnp.sqrt(jnp.float32(fan_in))
        return jax.random.uniform(k, shape, jnp.float32, -bound, bound)

    return {
        "w1": unif(k1, (zc_dim, 16), zc_dim),
        "bn1_gamma": jnp.ones((1, 16), jnp.float32),
        "bn1_beta": jnp.zeros((1, 16), jnp.float32),
        "bn1_mean": jnp.zeros((1, 16), jnp.float32),
        "bn1_var": jnp.ones((1, 16), jnp.float32),
        "w2": unif(k2, (16, 8), 16),
        "b2": unif(k3, (1, 8), 16),
        "bn2_gamma": jnp.ones((1, 8), jnp.float32),
        "bn2_beta": jnp.zeros((1, 8), jnp.float32),
        "bn2_mean": jnp.zeros((1, 8), jnp.float32),
        "bn2_var": jnp.ones((1, 8), jnp.float32),
        "w3": unif(k4, (8, out_dim), 8),
        "b3": unif(k5, (1, out_dim), 8),
    }


def reference_forward(z, p, target):
    """Pure-JAX reference with explicit (un-folded) eval-mode BatchNorm, for correctness."""
    def bn(x, g, b, m, v):
        return (x - m) * lax.rsqrt(v + BN_EPS) * g + b

    h = _leaky_relu(z @ p["w1"])
    h = bn(h, p["bn1_gamma"], p["bn1_beta"], p["bn1_mean"], p["bn1_var"])
    h = _leaky_relu(h @ p["w2"] + p["b2"])
    h = bn(h, p["bn2_gamma"], p["bn2_beta"], p["bn2_mean"], p["bn2_var"])
    y = h @ p["w3"] + p["b3"]
    if target == "D":
        y = jax.nn.sigmoid(y)
    return y


if __name__ == "__main__":
    # TODO(synk): training-mode Dropout masking / BatchNorm batch-stat updates are not
    # implemented; eval-mode (inference) semantics are used.
    zc_dim, out_dim = 12, 4
    key = jax.random.PRNGKey(0)
    kz1, kz2, kp = jax.random.split(key, 3)
    params = init_params(kp, zc_dim, out_dim)

    # Small demo batch, target 'D' (sigmoid path), single-tile grid.
    z_small = jax.random.normal(kz1, (8, zc_dim), jnp.float32)
    out_small = jax.block_until_ready(vae_decoder_forward(z_small, params, "D"))
    ref_small = reference_forward(z_small, params, "D")
    assert out_small.shape == (8, out_dim)
    assert jnp.allclose(out_small, ref_small, atol=1e-5, rtol=1e-4), "small-batch mismatch"

    # Larger batch, target 'Y' (no sigmoid): exercises padding + even multi-tile pipelined grid.
    z_large = jax.random.normal(kz2, (2500, zc_dim), jnp.float32)
    out_large = jax.block_until_ready(vae_decoder_forward(z_large, params, "Y"))
    ref_large = reference_forward(z_large, params, "Y")
    assert out_large.shape == (2500, out_dim)
    assert jnp.allclose(out_large, ref_large, atol=1e-5, rtol=1e-4), "large-batch mismatch"

    print("KERNEL_OK")
</pallas_src>

<mosaic_0001>
module attributes {stable_mosaic.version = 11 : i64} {
  func.func @vae_decoder_kernel(%arg0: i32, %arg1: memref<12x128xf32, #tpu.memory_space<vmem>>, %arg2: memref<16x12xf32, #tpu.memory_space<vmem>>, %arg3: memref<8x16xf32, #tpu.memory_space<vmem>>, %arg4: memref<8x1xf32, #tpu.memory_space<vmem>>, %arg5: memref<4x8xf32, #tpu.memory_space<vmem>>, %arg6: memref<4x1xf32, #tpu.memory_space<vmem>>, %arg7: memref<4x128xf32, #tpu.memory_space<vmem>>) attributes {dimension_semantics = [#tpu.dimension_semantics<parallel>], iteration_bounds = array<i64: 1>, scalar_prefetch = 0 : i64, scratch_operands = 0 : i64, tpu.core_type = #tpu.core_type<tc>, window_params = [{transform_indices = @transform_0, window_bounds = array<i64: 12, 128>}, {pipeline_mode = #tpu.pipeline_mode<synchronous>, transform_indices = @transform_1, window_bounds = array<i64: 16, 12>}, {pipeline_mode = #tpu.pipeline_mode<synchronous>, transform_indices = @transform_2, window_bounds = array<i64: 8, 16>}, {pipeline_mode = #tpu.pipeline_mode<synchronous>, transform_indices = @transform_3, window_bounds = array<i64: 8, 1>}, {pipeline_mode = #tpu.pipeline_mode<synchronous>, transform_indices = @transform_4, window_bounds = array<i64: 4, 8>}, {pipeline_mode = #tpu.pipeline_mode<synchronous>, transform_indices = @transform_5, window_bounds = array<i64: 4, 1>}, {transform_indices = @transform_6, window_bounds = array<i64: 4, 128>}]} {
    %c0 = arith.constant 0 : index
    %c0_0 = arith.constant 0 : index
    %0 = vector.load %arg2[%c0, %c0_0] : memref<16x12xf32, #tpu.memory_space<vmem>>, vector<16x12xf32>
    %c0_1 = arith.constant 0 : index
    %c0_2 = arith.constant 0 : index
    %1 = vector.load %arg1[%c0_1, %c0_2] : memref<12x128xf32, #tpu.memory_space<vmem>>, vector<12x128xf32>
    %cst = arith.constant dense<0.000000e+00> : vector<16x128xf32>
    %2 = tpu.matmul %0, %1, %cst {dimension_numbers = #tpu.dot_dimension_numbers<[1], [0], [0], [1], [0, 0, 1, 1], [], []>} : vector<16x12xf32>, vector<12x128xf32>, vector<16x128xf32> -> vector<16x128xf32>
    %cst_3 = arith.constant 0.000000e+00 : f32
    %3 = vector.broadcast %cst_3 : f32 to vector<16x128xf32>
    %4 = arith.cmpf oge, %2, %3 : vector<16x128xf32>
    %cst_4 = arith.constant 0.00999999977 : f32
    %5 = vector.broadcast %cst_4 : f32 to vector<16x128xf32>
    %6 = arith.mulf %5, %2 : vector<16x128xf32>
    %7 = arith.select %4, %2, %6 : vector<16x128xi1>, vector<16x128xf32>
    %c0_5 = arith.constant 0 : index
    %c0_6 = arith.constant 0 : index
    %8 = vector.load %arg3[%c0_5, %c0_6] : memref<8x16xf32, #tpu.memory_space<vmem>>, vector<8x16xf32>
    %cst_7 = arith.constant dense<0.000000e+00> : vector<8x128xf32>
    %9 = tpu.matmul %8, %7, %cst_7 {dimension_numbers = #tpu.dot_dimension_numbers<[1], [0], [0], [1], [0, 0, 1, 1], [], []>} : vector<8x16xf32>, vector<16x128xf32>, vector<8x128xf32> -> vector<8x128xf32>
    %c0_8 = arith.constant 0 : index
    %c0_9 = arith.constant 0 : index
    %10 = vector.load %arg4[%c0_8, %c0_9] : memref<8x1xf32, #tpu.memory_space<vmem>>, vector<8x1xf32>
    %11 = vector.broadcast %10 : vector<8x1xf32> to vector<8x128xf32>
    %12 = arith.addf %9, %11 : vector<8x128xf32>
    %cst_10 = arith.constant 0.000000e+00 : f32
    %13 = vector.broadcast %cst_10 : f32 to vector<8x128xf32>
    %14 = arith.cmpf oge, %12, %13 : vector<8x128xf32>
    %cst_11 = arith.constant 0.00999999977 : f32
    %15 = vector.broadcast %cst_11 : f32 to vector<8x128xf32>
    %16 = arith.mulf %15, %12 : vector<8x128xf32>
    %17 = arith.select %14, %12, %16 : vector<8x128xi1>, vector<8x128xf32>
    %c0_12 = arith.constant 0 : index
    %c0_13 = arith.constant 0 : index
    %18 = vector.load %arg5[%c0_12, %c0_13] : memref<4x8xf32, #tpu.memory_space<vmem>>, vector<4x8xf32>
    %cst_14 = arith.constant dense<0.000000e+00> : vector<4x128xf32>
    %19 = tpu.matmul %18, %17, %cst_14 {dimension_numbers = #tpu.dot_dimension_numbers<[1], [0], [0], [1], [0, 0, 1, 1], [], []>} : vector<4x8xf32>, vector<8x128xf32>, vector<4x128xf32> -> vector<4x128xf32>
    %c0_15 = arith.constant 0 : index
    %c0_16 = arith.constant 0 : index
    %20 = vector.load %arg6[%c0_15, %c0_16] : memref<4x1xf32, #tpu.memory_space<vmem>>, vector<4x1xf32>
    %21 = vector.broadcast %20 : vector<4x1xf32> to vector<4x128xf32>
    %22 = arith.addf %19, %21 : vector<4x128xf32>
    %cst_17 = arith.constant 0.000000e+00 : f32
    %23 = vector.broadcast %cst_17 : f32 to vector<4x128xf32>
    %24 = arith.subf %23, %22 : vector<4x128xf32>
    %25 = math.exp %24 : vector<4x128xf32>
    %cst_18 = arith.constant 1.000000e+00 : f32
    %26 = vector.broadcast %cst_18 : f32 to vector<4x128xf32>
    %27 = arith.addf %26, %25 : vector<4x128xf32>
    %cst_19 = arith.constant 1.000000e+00 : f32
    %28 = vector.broadcast %cst_19 : f32 to vector<4x128xf32>
    %29 = arith.divf %28, %27 : vector<4x128xf32>
    %c0_20 = arith.constant 0 : index
    %c0_21 = arith.constant 0 : index
    %30 = vector.load %arg7[%c0_20, %c0_21] : memref<4x128xf32, #tpu.memory_space<vmem>>, vector<4x128xf32>
    tpu.vector_store %arg7[%c0_20, %c0_21], %29 {strides = array<i32>} : memref<4x128xf32, #tpu.memory_space<vmem>>, vector<4x128xf32>,
    return
  }
  func.func @transform_0(%arg0: i32) -> (i32, i32) {
    %c0_i32 = arith.constant 0 : i32
    %c0_i32_0 = arith.constant 0 : i32
    return %c0_i32, %arg0 : i32, i32
  }
  func.func @transform_1(%arg0: i32) -> (i32, i32) {
    %c0_i32 = arith.constant 0 : i32
    %c0_i32_0 = arith.constant 0 : i32
    %c0_i32_1 = arith.constant 0 : i32
    return %c0_i32, %c0_i32_0 : i32, i32
  }
  func.func @transform_2(%arg0: i32) -> (i32, i32) {
    %c0_i32 = arith.constant 0 : i32
    %c0_i32_0 = arith.constant 0 : i32
    %c0_i32_1 = arith.constant 0 : i32
    return %c0_i32, %c0_i32_0 : i32, i32
  }
  func.func @transform_3(%arg0: i32) -> (i32, i32) {
    %c0_i32 = arith.constant 0 : i32
    %c0_i32_0 = arith.constant 0 : i32
    %c0_i32_1 = arith.constant 0 : i32
    return %c0_i32, %c0_i32_0 : i32, i32
  }
  func.func @transform_4(%arg0: i32) -> (i32, i32) {
    %c0_i32 = arith.constant 0 : i32
    %c0_i32_0 = arith.constant 0 : i32
    %c0_i32_1 = arith.constant 0 : i32
    return %c0_i32, %c0_i32_0 : i32, i32
  }
  func.func @transform_5(%arg0: i32) -> (i32, i32) {
    %c0_i32 = arith.constant 0 : i32
    %c0_i32_0 = arith.constant 0 : i32
    %c0_i32_1 = arith.constant 0 : i32
    return %c0_i32, %c0_i32_0 : i32, i32
  }
  func.func @transform_6(%arg0: i32) -> (i32, i32) {
    %c0_i32 = arith.constant 0 : i32
    %c0_i32_0 = arith.constant 0 : i32
    return %c0_i32, %arg0 : i32, i32
  }
}

</mosaic_0001>

<bundles_post_ra>
// kernel: tpu_custom_call.1
= control target key start
LH: loop header
LB: loop body
LE: loop exit
PB: predicated region body
PF: predicated region fallthrough
CT: control target
= control target key end

     0   :  { %11 = vsyncpa [#allocation3], 0  ;;  %s559_s0 = inlined_call_operand.hbm [shape: f32[12,128], index: 0, kind: input, shape index: {}]   ;;  %s560_s1 = inlined_call_operand.vmem [shape: f32[16,12], index: 1, kind: input, shape index: {}]   ;;  %s561_s2 = inlined_call_operand.hbm [shape: f32[8,16], index: 2, kind: input, shape index: {}]   ;;  %s562_s3 = inlined_call_operand.vmem [shape: f32[8,1], index: 3, kind: input, shape index: {}]   ;;  %s563_s4 = inlined_call_operand.vmem [shape: f32[4,8], index: 4, kind: input, shape index: {}]   ;;  %s564_s5 = inlined_call_operand.vmem [shape: f32[4,1], index: 5, kind: input, shape index: {}]   ;;  %s565_s6 = inlined_call_operand.hbm [shape: f32[4,128], index: 6, kind: output, shape index: {}]  }
   0x1   :  { %12 = vsyncpa [#allocation6], 0 }
   0x2   :  { %13 = vsyncpa [#allocation4], 0  ;;  %s463_s21 = smov [#allocation2]   ;;  %s391_s25 = scalar_lea.hbm %s559_s0, 256 }
   0x3   :  { %s19_s22 = sshll.u32 %s463_s21, 4  ;;  %p392_p0 = scmp.ne.s32.totalorder %s559_s0, %s391_s25  ;;  %s20_s22 = int_to_ptr.vmem [resolvable:$true] %s19_s22 }
   0x4   :  { %p395_p1 = scmp.lt.u32.totalorder %s391_s25, %s559_s0 }
   0x6   :  { %p397_p2 = pnand %p395_p1, %p392_p0 }
   0x8   :  { %400 = shalt.err (!%p397_p2)
}
   0x9   :  { %s401_s30 = scalar_lea.vmem %s20_s22, 256  ;;  %p406_p4 = scmp.lt.s32.totalorder %s20_s22, %s20_s22 }
   0xa   :  { %p402_p3 = scmp.ne.s32.totalorder %s20_s22, %s401_s30  ;;  %p407_p5 = scmp.lt.s32.totalorder %s401_s30, %s401_s30 }
   0xc   :  { %p408_p6 = por %p407_p5, %p406_p4 }
   0xe   :  { %p409_p7 = pnand %p408_p6, %p402_p3 }
  0x10   :  { %412 = shalt.err (!%p409_p7)
}
  0x11   :  { %s464_s7 = smov 128   ;;  %s465_s8 = smov 8  }
  0x12   :  { %25 = dma.hbm_to_vmem [thread:$0]  %s559_s0, 256, %s20_s22, [#allocation3], %s464_s7, %s464_s7, %s465_s8  }
  0x13   :  { %s466_s11 = smov [#allocation5]   ;;  %s413_s15 = scalar_lea.hbm %s561_s2, 128 }
  0x14   :  { %s34_s12 = sshll.u32 %s466_s11, 4  ;;  %p414_p8 = scmp.ne.s32.totalorder %s561_s2, %s413_s15  ;;  %s35_s12 = int_to_ptr.vmem [resolvable:$true] %s34_s12 }
  0x15   :  { %p417_p9 = scmp.lt.u32.totalorder %s413_s15, %s561_s2 }
  0x17   :  { %p419_p10 = pnand %p417_p9, %p414_p8 }
  0x19   :  { %422 = shalt.err (!%p419_p10)
}
  0x1a   :  { %s423_s20 = scalar_lea.vmem %s35_s12, 128  ;;  %p428_p12 = scmp.lt.s32.totalorder %s35_s12, %s35_s12 }
  0x1b   :  { %p424_p11 = scmp.ne.s32.totalorder %s35_s12, %s423_s20  ;;  %p429_p13 = scmp.lt.s32.totalorder %s423_s20, %s423_s20 }
  0x1d   :  { %p430_p0 = por %p429_p13, %p428_p12 }
  0x1f   :  { %p431_p1 = pnand %p430_p0, %p424_p11 }
  0x21   :  { %434 = shalt.err (!%p431_p1)
}
  0x22   :  { %37 = dma.hbm_to_vmem [thread:$0]  %s561_s2, 128, %s35_s12, [#allocation6]  }
  0x23   :  { %457 = dma.done.wait [#allocation3], 256  }
  0x24   :  { %458 = vsyncadd [#allocation3], 4294967040 }
  0x25   :  { %459 = dma.done.wait [#allocation6], 128  }
  0x26   :  { %460 = vsyncadd [#allocation6], 4294967168  ;;  %vm61_vm0 = vcmask 1043456   ;;  %vm54_vm1 = vcmask 97280   ;;  %vm467_vm2 = vmmov 1   ;;  %v52_v0 = vld [vmem:[#allocation2] sm:$0xff] }
  0x27   :  { %vm368_vm3 = vmpackc.low %vm61_vm0, %vm467_vm2  ;;  %v53_v1 = vld [vmem:[#allocation2 + $0x8] sm:$0xf]  ;;  %v50_v2 = vld [vmem:[%s560_s1] sm:$0xff]  ;;  %v468_v5 = vmov 0.0|0.0   ;;  %vm469_vm4 = vmmov 0   ;;  %v470_v6 = vmov 0.0  }
  0x28   :  { %v367_v3 = vpack.c.bf16 %v53_v1, %v52_v0  ;;  %352 = vmatprep.mubr.msk.f32.mxu0 %vm54_vm1, %v50_v2  ;;  %v51_v4 = vld [vmem:[%s560_s1 + $0x8] sm:$0xff]  ;;  %373 = vmatprep.subr.bf16.mxu1 %v468_v5  ;;  %v147_v7 = vld [vmem:[%s562_s3] sm:$0xff]  ;;  %v471_v8 = vmov 0   ;;  %v146_v17 = vld [vmem:[#allocation5] sm:$0xff]  ;;  %vm153_vm7 = vcmask 130048   ;;  %vm237_vm9 = vcmask 64512  }
  0x29   :  { %359 = vmatprep.mubr.msk.f32.mxu1 %vm469_vm4, %v470_v6  ;;  %386 = vset.pattern.permute.xlu0 %v471_v8  ;;  %v231_v9 = vld [vmem:[%s564_s5] sm:$0xf]  ;;  %s472_s5 = smov [#allocation7]  }
  0x2a   :  { %369 = vmatprep.subr.msk.bf16.mxu0 %vm368_vm3, %v367_v3  ;;  %150 = vperm.xlu0 %386, %v147_v7   ;;  %v230_v23 = vld [vmem:[%s563_s4] sm:$0xf]  ;;  %s324_s29 = sshll.u32 %s472_s5, 4  ;;  %s325_s29 = int_to_ptr.vmem [resolvable:$true] %s324_s29 }
  0x2b   :  { %372 = vmatpush3.bf16.msk.msra.mxu0 %vm368_vm3, %v367_v3  ;;  %s435_s4 = scalar_lea.vmem %s325_s29, 64  ;;  %p440_p3 = scmp.lt.s32.totalorder %s325_s29, %s325_s29 }
  0x2c   :  { %362 = vmatprep.subr.mxu0 %v470_v6  ;;  %p436_p2 = scmp.ne.s32.totalorder %s325_s29, %s435_s4  ;;  %p441_p4 = scmp.lt.s32.totalorder %s435_s4, %s435_s4 }
  0x2e   :  { %353 = vmatmul.mubr.msk.f32.vlgmr.msra.gmra.mrb[0].mxu0 %vm54_vm1, %v51_v4  ;;  %234 = vperm.xlu0 %386, %v231_v9   ;;  %p442_p5 = por %p441_p4, %p440_p3 }
  0x2f   :  { %364 = vmatprep.mubr.msk.f32.mxu0 %vm469_vm4, %v470_v6 }
  0x30   :  { %p443_p6 = pnand %p442_p5, %p436_p2 }
  0xa9   :  { %v151_v18 = vpop.permute.xlu0 %150 }
  0xad   :  { %v235_v25 = vpop.permute.xlu0 %234 }
 0x101   :  { %v354_v10 = vpop.f32.mrb[0].mxu0 }
 0x102   :  { %vm141_vm5 = vcmp.ge.f32.partialorder %v354_v10, 0.0  ;;  %v143_v11 = vmul.f32 0.01, %v354_v10  ;;  %v131_v12 = vpop.f32.mrb[1].mxu0 }
 0x103   :  { %vm140_vm6 = vcmp.ge.f32.partialorder %v131_v12, 0.0  ;;  %v142_v13 = vmul.f32 0.01, %v131_v12 }
 0x104   :  { %v145_v14 = vsel %vm141_vm5, %v354_v10, %v143_v11 }
 0x105   :  { %v144_v15 = vsel %vm140_vm6, %v131_v12, %v142_v13 }
 0x106   :  { %v374_v16 = vpack.c.bf16 %v145_v14, %v144_v15 }
 0x108   :  { %375 = vmatpush3.bf16.msra.mxu1 %v374_v16 }
 0x10b   :  { %360 = vmatmul.mubr.msk.f32.vlgmr.msra.gmra.mrb[0].mxu1 %vm153_vm7, %v146_v17 }
 0x1de   :  { %v223_v19 = vpop.f32.mrb[0].mxu1 }
 0x1df   :  { %v224_v20 = vadd.f32 %v223_v19, %v151_v18  ;;  %v361_v21 = vpop.f32.mrb[1].mxu1 }
 0x1e1   :  { %vm227_vm8 = vcmp.ge.f32.partialorder %v224_v20, 0.0  ;;  %v228_v22 = vmul.f32 0.01, %v224_v20 }
 0x1e3   :  { %v229_v24 = vsel %vm227_vm8, %v224_v20, %v228_v22 }
 0x1e4   :  { %363 = vmatpush3.msra.mxu0 %v229_v24 }
 0x1e5   :  { %365 = vmatmul.mubr.msk.f32.vlgmr.msra.gmra.mrb[2].mxu0 %vm237_vm9, %v230_v23 }
 0x2b8   :  { %v307_v26 = vpop.f32.mrb[2].mxu0 }
 0x2b9   :  { %v308_v27 = vadd.f32 %v307_v26, %v235_v25  ;;  %v366_v28 = vpop.f32.mrb[3].mxu0 }
 0x2bb   :  { %v311_v29 = vsub.f32 0.0, %v308_v27 }
 0x2bd   :  { %v312_v30 = vmul.f32 1.442695, %v311_v29 }
 0x2bf   :  { %387 = vpow2.f32 %v312_v30 }
 0x2c9   :  { %v388_v31 = vpop.eup %387 }
 0x2ca   :  { %v314_v32 = vadd.f32 1.0, %v388_v31 }
 0x2cc   :  { %389 = vrcp.f32 %v314_v32 }
 0x2d6   :  { %v390_v33 = vpop.eup %389 }
 0x2d7   :  { %317 = vst [vmem:[#allocation7] sm:$0xf] %v390_v33 }
 0x2d8   :  { %446 = shalt.err (!%p443_p6)
}
 0x2d9   :  { %s447_s8 = scalar_lea.hbm %s565_s6, 64 }
 0x2da   :  { %p448_p7 = scmp.ne.s32.totalorder %s565_s6, %s447_s8  ;;  %p451_p8 = scmp.lt.u32.totalorder %s447_s8, %s565_s6 }
 0x2dc   :  { %p453_p9 = pnand %p451_p8, %p448_p7 }
 0x2de   :  { %456 = shalt.err (!%p453_p9)
}
 0x2df   :  { %327 = dma.vmem_to_hbm [thread:$0]  %s325_s29, 64, %s565_s6, [#allocation4]  }
 0x2e0   :  { %461 = dma.done.wait [#allocation4], 64  }
 0x2e1   :  { %462 = vsyncadd [#allocation4], 4294967232 }
 0x2e2   :  { %331 = vsyncpa [#allocation3], 1 }
 0x2e3   :  { %332 = vsyncpa [#allocation6], 1 }
 0x2e4   :  { %333 = vsyncpa [#allocation4], 1 }

</bundles_post_ra>
